<compile_context>
chip_gen: v7x
topology: tpu7x:2x2x1
jax: 0.10.0
libtpu: 0.0.40
codegen_flags: <defaults>
</compile_context>

<pallas_src>
import jax
import jax.numpy as jnp
from jax.experimental import pallas as pl
from jax.experimental.pallas import tpu as pltpu


def _round_up(x, m):
    return ((x + m - 1) // m) * m


# ---------------------------------------------------------------------------
# Kernel
# ---------------------------------------------------------------------------
def actor_kernel(scale_ref,                       # SMEM (1,1) f32
                 s_ref, a_ref,                    # [3, T] state / action (f32)
                 gwT_ref, gb_ref,                 # [L, 3] bf16, [L, 1] f32
                 w1T_ref, b1_ref,                 # [2H, L] bf16, [2H, 1] f32
                 w2T_ref, b2_ref,                 # [2H, 2H] bf16 block-diag, [2H, 1] f32
                 w3T_ref, b3_ref,                 # [8, 2H] bf16, [8, 1] f32
                 out_ref):                        # [8, T] f32
    pos_scale = scale_ref[0, 0]
    s = s_ref[...]                                # [3, T] f32
    a = a_ref[...]                                # [3, T] f32

    # GNN stand-in embedding (bf16 MXU operands, f32 accumulation).
    node = jnp.maximum(
        jnp.dot(gwT_ref[...], s.astype(jnp.bfloat16),
                preferred_element_type=jnp.float32) + gb_ref[...], 0.0)

    # Fused mu/sigma MLP (Linear -> ReLU -> Linear -> ReLU -> Linear).
    h = jnp.maximum(
        jnp.dot(w1T_ref[...], node.astype(jnp.bfloat16),
                preferred_element_type=jnp.float32) + b1_ref[...], 0.0)
    h = jnp.maximum(
        jnp.dot(w2T_ref[...], h.astype(jnp.bfloat16),
                preferred_element_type=jnp.float32) + b2_ref[...], 0.0)
    y = jnp.dot(w3T_ref[...], h.astype(jnp.bfloat16),
                preferred_element_type=jnp.float32) + b3_ref[...]          # [8, T] f32

    mu = jnp.tanh(y[0:3, :]) * pos_scale                        # [3, T]
    sigma = (jax.nn.sigmoid(y[3:6, :]) + 1e-8) * pos_scale      # [3, T]

    # Normal(mu, sigma).log_prob(a), reduced over the 3 coords (cheap sublane add).
    inv_sigma = pl.reciprocal(sigma, approx=True)               # EUP, not VALU divide
    z = (a - mu) * inv_sigma
    lp = -0.5 * z * z - jnp.log(sigma) - 0.5 * jnp.log(2.0 * jnp.pi)
    lp_row = jnp.sum(lp, axis=0, keepdims=True)                 # [1, T]

    # Single unmasked full-tile store.
    out_ref[...] = jnp.concatenate(
        [mu, sigma, lp_row, jnp.zeros_like(lp_row)], axis=0)


# ---------------------------------------------------------------------------
# Parameter init / fusion (one-time, outside the kernel)
# ---------------------------------------------------------------------------
def xavier_uniform(key, shape):
    fan_in, fan_out = shape
    limit = (6.0 / (fan_in + fan_out)) ** 0.5
    return jax.random.uniform(key, shape, jnp.float32, -limit, limit)


def init_params(key, latent, hidden):
    ks = jax.random.split(key, 7)
    gw = xavier_uniform(ks[0], (3, latent));        gb = jnp.zeros((1, latent), jnp.float32)
    mw1 = xavier_uniform(ks[1], (latent, hidden));  mb1 = jnp.zeros((1, hidden), jnp.float32)
    mw2 = xavier_uniform(ks[2], (hidden, hidden));  mb2 = jnp.zeros((1, hidden), jnp.float32)
    mw3 = xavier_uniform(ks[3], (hidden, 3));       mb3 = jnp.zeros((1, 3), jnp.float32)
    sw1 = xavier_uniform(ks[4], (latent, hidden));  sb1 = jnp.zeros((1, hidden), jnp.float32)
    sw2 = xavier_uniform(ks[5], (hidden, hidden));  sb2 = jnp.zeros((1, hidden), jnp.float32)
    sw3 = xavier_uniform(ks[6], (hidden, 3));       sb3 = jnp.zeros((1, 3), jnp.float32)
    return (gw, gb, mw1, mb1, mw2, mb2, mw3, mb3, sw1, sb1, sw2, sb2, sw3, sb3)


def fuse_params(raw):
    """Build the transposed / fused (bf16-weight) set consumed by the kernel."""
    (gw, gb, mw1, mb1, mw2, mb2, mw3, mb3, sw1, sb1, sw2, sb2, sw3, sb3) = raw
    hidden = mw1.shape[1]

    # GNN embedding: [latent, 3], acts on the state rows only.
    gwT = gw.T.astype(jnp.bfloat16)
    gbc = gb.reshape(-1, 1)

    # Layer 1: stack mu/sigma branches -> [2H, L].
    w1T = jnp.concatenate([mw1.T, sw1.T], axis=0).astype(jnp.bfloat16)
    b1c = jnp.concatenate([mb1.reshape(hidden, 1), sb1.reshape(hidden, 1)], axis=0)

    # Layer 2: block-diagonal -> [2H, 2H].
    w2T = jnp.zeros((2 * hidden, 2 * hidden), jnp.float32)
    w2T = w2T.at[:hidden, :hidden].set(mw2.T).at[hidden:, hidden:].set(sw2.T)
    w2T = w2T.astype(jnp.bfloat16)
    b2c = jnp.concatenate([mb2.reshape(hidden, 1), sb2.reshape(hidden, 1)], axis=0)

    # Layer 3: rows 0-2 mu head, rows 3-5 sigma head, rows 6-7 pad -> [8, 2H].
    w3T = jnp.zeros((8, 2 * hidden), jnp.float32)
    w3T = w3T.at[0:3, :hidden].set(mw3.T).at[3:6, hidden:].set(sw3.T)
    w3T = w3T.astype(jnp.bfloat16)
    b3c = jnp.zeros((8, 1), jnp.float32)
    b3c = b3c.at[0:3, 0].set(mb3.reshape(3)).at[3:6, 0].set(sb3.reshape(3))

    return (gwT, gbc, w1T, b1c, w2T, b2c, w3T, b3c)


# ---------------------------------------------------------------------------
# Wrapper
# ---------------------------------------------------------------------------
def actor_forward(state, action, fused_params, pos_scale, *,
                  tile_m=16384, transpose_outputs=True):
    """state, action: [B, N, 3] -> (log_prob [B], mu, sigma).

    mu/sigma are returned as [B*N, 3] when transpose_outputs=True (module semantics);
    pass transpose_outputs=False to get the lane-major [3, B*N] layout and skip the
    two wrapper transposes (cheaper for downstream consumers that can take it).
    """
    B, N, _ = state.shape
    M = B * N

    # Tile selection: columns rounded to 128 only (no round-to-tile waste), split
    # evenly into >=2 grid steps whenever possible so both v7x TensorCores work.
    M128 = _round_up(M, 128)
    n_steps = pl.cdiv(M128, tile_m)
    if M128 > 128:
        n_steps = max(n_steps, 2)
    tm = _round_up(pl.cdiv(M128, n_steps), 128)
    n_steps = pl.cdiv(M128, tm)
    M_pad = n_steps * tm                      # pad bounded by ~n_steps*128 columns

    # Lane-dense inputs: two [3, M_pad] slabs (no zero rows, no scatter pack).
    state_t = jnp.pad(state.reshape(M, 3).astype(jnp.float32).T,
                      ((0, 0), (0, M_pad - M)))
    action_t = jnp.pad(action.reshape(M, 3).astype(jnp.float32).T,
                       ((0, 0), (0, M_pad - M)))

    scale = jnp.full((1, 1), pos_scale, jnp.float32)

    gwT, gbc, w1T, b1c, w2T, b2c, w3T, b3c = fused_params
    latent = gwT.shape[0]
    h2 = w1T.shape[0]

    def const_spec(shape):
        # Whole weight DMA'd once; constant index -> stays resident across the grid.
        return pl.BlockSpec(shape, lambda i: (0, 0))

    out = pl.pallas_call(
        actor_kernel,
        out_shape=jax.ShapeDtypeStruct((8, M_pad), jnp.float32),
        grid=(n_steps,),
        in_specs=[
            pl.BlockSpec(memory_space=pltpu.MemorySpace.SMEM),   # pos_scale scalar
            pl.BlockSpec((3, tm), lambda i: (0, i)),             # state_T
            pl.BlockSpec((3, tm), lambda i: (0, i)),             # action_T
            const_spec((latent, 3)), const_spec((latent, 1)),
            const_spec((h2, latent)), const_spec((h2, 1)),
            const_spec((h2, h2)), const_spec((h2, 1)),
            const_spec((8, h2)), const_spec((8, 1)),
        ],
        out_specs=pl.BlockSpec((8, tm), lambda i: (0, i)),
        compiler_params=pltpu.CompilerParams(
            dimension_semantics=("parallel",),
            vmem_limit_bytes=48 * 1024 * 1024),
    )(scale, state_t, action_t, gwT, gbc, w1T, b1c, w2T, b2c, w3T, b3c)

    log_prob = out[6, :M].reshape(B, N).sum(axis=1)   # sum over atoms (coords in-kernel)
    mu_t = out[0:3, :M]                               # [3, M]
    sigma_t = out[3:6, :M]                            # [3, M]
    if transpose_outputs:
        return log_prob, mu_t.T, sigma_t.T
    return log_prob, mu_t, sigma_t


# ---------------------------------------------------------------------------
# Pure-JAX reference (same stand-in GNN) for a correctness check
# ---------------------------------------------------------------------------
def actor_reference(state, action, raw_params, pos_scale):
    (gw, gb, mw1, mb1, mw2, mb2, mw3, mb3, sw1, sb1, sw2, sb2, sw3, sb3) = raw_params
    B, N, _ = state.shape
    hi = jax.lax.Precision.HIGHEST
    x = state.reshape(-1, 3).astype(jnp.float32)
    a = action.reshape(-1, 3).astype(jnp.float32)
    node = jax.nn.relu(jnp.dot(x, gw, precision=hi) + gb)
    h = jax.nn.relu(jnp.dot(node, mw1, precision=hi) + mb1)
    h = jax.nn.relu(jnp.dot(h, mw2, precision=hi) + mb2)
    mu = jnp.tanh(jnp.dot(h, mw3, precision=hi) + mb3) * pos_scale
    h = jax.nn.relu(jnp.dot(node, sw1, precision=hi) + sb1)
    h = jax.nn.relu(jnp.dot(h, sw2, precision=hi) + sb2)
    sigma = (jax.nn.sigmoid(jnp.dot(h, sw3, precision=hi) + sb3) + 1e-8) * pos_scale
    lp = (-((a - mu) ** 2) / (2.0 * sigma * sigma)
          - jnp.log(sigma) - 0.5 * jnp.log(2.0 * jnp.pi))
    log_prob = lp.reshape(B, N * 3).sum(axis=1)
    return log_prob, mu, sigma


if __name__ == "__main__":
    key = jax.random.PRNGKey(0)
    B, N = 2, 8                  # batch_size, num_atoms
    LATENT, HIDDEN = 32, 32      # latent_size, mlp_hidden_size (mlp_layers = 2)
    POS_SCALE = 0.5

    k_state, k_action, k_params = jax.random.split(key, 3)
    state = jax.random.normal(k_state, (B, N, 3), jnp.float32)
    action = jax.random.normal(k_action, (B, N, 3), jnp.float32)
    raw_params = init_params(k_params, LATENT, HIDDEN)
    fused = fuse_params(raw_params)

    log_prob, mu, sigma = actor_forward(state, action, fused, POS_SCALE)
    jax.block_until_ready((log_prob, mu, sigma))

    assert log_prob.shape == (B,)
    assert mu.shape == (B * N, 3)
    assert sigma.shape == (B * N, 3)
    assert bool(jnp.all(sigma > 0.0))

    # Tolerances account for bf16 MXU operands (f32 accumulation) vs HIGHEST-precision
    # f32 reference.
    ref_lp, ref_mu, ref_sigma = actor_reference(state, action, raw_params, POS_SCALE)
    assert bool(jnp.allclose(mu, ref_mu, atol=3e-2, rtol=3e-2))
    assert bool(jnp.allclose(sigma, ref_sigma, atol=3e-2, rtol=3e-2))
    assert bool(jnp.allclose(log_prob, ref_lp, atol=5e-1, rtol=5e-2))

    print("KERNEL_OK")
</pallas_src>

<mosaic_0001>
module attributes {stable_mosaic.version = 11 : i64} {
  func.func @actor_kernel(%arg0: i32, %arg1: memref<1x1xf32, #tpu.memory_space<smem>>, %arg2: memref<3x128xf32, #tpu.memory_space<vmem>>, %arg3: memref<3x128xf32, #tpu.memory_space<vmem>>, %arg4: memref<32x3xbf16, #tpu.memory_space<vmem>>, %arg5: memref<32x1xf32, #tpu.memory_space<vmem>>, %arg6: memref<64x32xbf16, #tpu.memory_space<vmem>>, %arg7: memref<64x1xf32, #tpu.memory_space<vmem>>, %arg8: memref<64x64xbf16, #tpu.memory_space<vmem>>, %arg9: memref<64x1xf32, #tpu.memory_space<vmem>>, %arg10: memref<8x64xbf16, #tpu.memory_space<vmem>>, %arg11: memref<8x1xf32, #tpu.memory_space<vmem>>, %arg12: memref<8x128xf32, #tpu.memory_space<vmem>>) attributes {dimension_semantics = [#tpu.dimension_semantics<parallel>], iteration_bounds = array<i64: 1>, scalar_prefetch = 0 : i64, scratch_operands = 0 : i64, tpu.core_type = #tpu.core_type<tc>, window_params = [{transform_indices = @transform_0, window_bounds = array<i64: 1, 1>}, {transform_indices = @transform_1, window_bounds = array<i64: 3, 128>}, {transform_indices = @transform_2, window_bounds = array<i64: 3, 128>}, {pipeline_mode = #tpu.pipeline_mode<synchronous>, transform_indices = @transform_3, window_bounds = array<i64: 32, 3>}, {pipeline_mode = #tpu.pipeline_mode<synchronous>, transform_indices = @transform_4, window_bounds = array<i64: 32, 1>}, {pipeline_mode = #tpu.pipeline_mode<synchronous>, transform_indices = @transform_5, window_bounds = array<i64: 64, 32>}, {pipeline_mode = #tpu.pipeline_mode<synchronous>, transform_indices = @transform_6, window_bounds = array<i64: 64, 1>}, {pipeline_mode = #tpu.pipeline_mode<synchronous>, transform_indices = @transform_7, window_bounds = array<i64: 64, 64>}, {pipeline_mode = #tpu.pipeline_mode<synchronous>, transform_indices = @transform_8, window_bounds = array<i64: 64, 1>}, {pipeline_mode = #tpu.pipeline_mode<synchronous>, transform_indices = @transform_9, window_bounds = array<i64: 8, 64>}, {pipeline_mode = #tpu.pipeline_mode<synchronous>, transform_indices = @transform_10, window_bounds = array<i64: 8, 1>}, {transform_indices = @transform_11, window_bounds = array<i64: 8, 128>}]} {
    %c0 = arith.constant 0 : index
    %c0_0 = arith.constant 0 : index
    %0 = memref.load %arg1[%c0, %c0_0] : memref<1x1xf32, #tpu.memory_space<smem>>
    %c0_1 = arith.constant 0 : index
    %c0_2 = arith.constant 0 : index
    %1 = vector.load %arg2[%c0_1, %c0_2] : memref<3x128xf32, #tpu.memory_space<vmem>>, vector<3x128xf32>
    %c0_3 = arith.constant 0 : index
    %c0_4 = arith.constant 0 : index
    %2 = vector.load %arg3[%c0_3, %c0_4] : memref<3x128xf32, #tpu.memory_space<vmem>>, vector<3x128xf32>
    %c0_5 = arith.constant 0 : index
    %c0_6 = arith.constant 0 : index
    %3 = vector.load %arg4[%c0_5, %c0_6] : memref<32x3xbf16, #tpu.memory_space<vmem>>, vector<32x3xbf16>
    %4 = arith.truncf %1 : vector<3x128xf32> to vector<3x128xbf16>
    %cst = arith.constant dense<0.000000e+00> : vector<32x128xf32>
    %5 = tpu.matmul %3, %4, %cst {dimension_numbers = #tpu.dot_dimension_numbers<[1], [0], [0], [1], [0, 0, 1, 1], [], []>} : vector<32x3xbf16>, vector<3x128xbf16>, vector<32x128xf32> -> vector<32x128xf32>
    %c0_7 = arith.constant 0 : index
    %c0_8 = arith.constant 0 : index
    %6 = vector.load %arg5[%c0_7, %c0_8] : memref<32x1xf32, #tpu.memory_space<vmem>>, vector<32x1xf32>
    %7 = vector.broadcast %6 : vector<32x1xf32> to vector<32x128xf32>
    %8 = arith.addf %5, %7 : vector<32x128xf32>
    %cst_9 = arith.constant 0.000000e+00 : f32
    %9 = vector.broadcast %cst_9 : f32 to vector<32x128xf32>
    %10 = arith.maximumf %8, %9 : vector<32x128xf32>
    %c0_10 = arith.constant 0 : index
    %c0_11 = arith.constant 0 : index
    %11 = vector.load %arg6[%c0_10, %c0_11] : memref<64x32xbf16, #tpu.memory_space<vmem>>, vector<64x32xbf16>
    %12 = arith.truncf %10 : vector<32x128xf32> to vector<32x128xbf16>
    %cst_12 = arith.constant dense<0.000000e+00> : vector<64x128xf32>
    %13 = tpu.matmul %11, %12, %cst_12 {dimension_numbers = #tpu.dot_dimension_numbers<[1], [0], [0], [1], [0, 0, 1, 1], [], []>} : vector<64x32xbf16>, vector<32x128xbf16>, vector<64x128xf32> -> vector<64x128xf32>
    %c0_13 = arith.constant 0 : index
    %c0_14 = arith.constant 0 : index
    %14 = vector.load %arg7[%c0_13, %c0_14] : memref<64x1xf32, #tpu.memory_space<vmem>>, vector<64x1xf32>
    %15 = vector.broadcast %14 : vector<64x1xf32> to vector<64x128xf32>
    %16 = arith.addf %13, %15 : vector<64x128xf32>
    %cst_15 = arith.constant 0.000000e+00 : f32
    %17 = vector.broadcast %cst_15 : f32 to vector<64x128xf32>
    %18 = arith.maximumf %16, %17 : vector<64x128xf32>
    %c0_16 = arith.constant 0 : index
    %c0_17 = arith.constant 0 : index
    %19 = vector.load %arg8[%c0_16, %c0_17] : memref<64x64xbf16, #tpu.memory_space<vmem>>, vector<64x64xbf16>
    %20 = arith.truncf %18 : vector<64x128xf32> to vector<64x128xbf16>
    %cst_18 = arith.constant dense<0.000000e+00> : vector<64x128xf32>
    %21 = tpu.matmul %19, %20, %cst_18 {dimension_numbers = #tpu.dot_dimension_numbers<[1], [0], [0], [1], [0, 0, 1, 1], [], []>} : vector<64x64xbf16>, vector<64x128xbf16>, vector<64x128xf32> -> vector<64x128xf32>
    %c0_19 = arith.constant 0 : index
    %c0_20 = arith.constant 0 : index
    %22 = vector.load %arg9[%c0_19, %c0_20] : memref<64x1xf32, #tpu.memory_space<vmem>>, vector<64x1xf32>
    %23 = vector.broadcast %22 : vector<64x1xf32> to vector<64x128xf32>
    %24 = arith.addf %21, %23 : vector<64x128xf32>
    %cst_21 = arith.constant 0.000000e+00 : f32
    %25 = vector.broadcast %cst_21 : f32 to vector<64x128xf32>
    %26 = arith.maximumf %24, %25 : vector<64x128xf32>
    %c0_22 = arith.constant 0 : index
    %c0_23 = arith.constant 0 : index
    %27 = vector.load %arg10[%c0_22, %c0_23] : memref<8x64xbf16, #tpu.memory_space<vmem>>, vector<8x64xbf16>
    %28 = arith.truncf %26 : vector<64x128xf32> to vector<64x128xbf16>
    %cst_24 = arith.constant dense<0.000000e+00> : vector<8x128xf32>
    %29 = tpu.matmul %27, %28, %cst_24 {dimension_numbers = #tpu.dot_dimension_numbers<[1], [0], [0], [1], [0, 0, 1, 1], [], []>} : vector<8x64xbf16>, vector<64x128xbf16>, vector<8x128xf32> -> vector<8x128xf32>
    %c0_25 = arith.constant 0 : index
    %c0_26 = arith.constant 0 : index
    %30 = vector.load %arg11[%c0_25, %c0_26] : memref<8x1xf32, #tpu.memory_space<vmem>>, vector<8x1xf32>
    %31 = vector.broadcast %30 : vector<8x1xf32> to vector<8x128xf32>
    %32 = arith.addf %29, %31 : vector<8x128xf32>
    %33 = vector.extract_strided_slice %32 {offsets = [0, 0], sizes = [3, 128], strides = [1, 1]} : vector<8x128xf32> to vector<3x128xf32>
    %34 = math.tanh %33 : vector<3x128xf32>
    %35 = vector.broadcast %0 : f32 to vector<3x128xf32>
    %36 = arith.mulf %34, %35 : vector<3x128xf32>
    %37 = vector.extract_strided_slice %32 {offsets = [3, 0], sizes = [3, 128], strides = [1, 1]} : vector<8x128xf32> to vector<3x128xf32>
    %38 = arith.negf %37 : vector<3x128xf32>
    %39 = math.exp %38 : vector<3x128xf32>
    %cst_27 = arith.constant 1.000000e+00 : f32
    %40 = vector.broadcast %cst_27 : f32 to vector<3x128xf32>
    %41 = arith.addf %40, %39 : vector<3x128xf32>
    %42 = arith.divf %40, %41 : vector<3x128xf32>
    %cst_28 = arith.constant 9.99999993E-9 : f32
    %43 = vector.broadcast %cst_28 : f32 to vector<3x128xf32>
    %44 = arith.addf %42, %43 : vector<3x128xf32>
    %45 = vector.broadcast %0 : f32 to vector<3x128xf32>
    %46 = arith.mulf %44, %45 : vector<3x128xf32>
    %47 = tpu.reciprocal %46 {approx = true} : vector<3x128xf32> -> vector<3x128xf32>
    %48 = arith.subf %2, %36 : vector<3x128xf32>
    %49 = arith.mulf %48, %47 : vector<3x128xf32>
    %cst_29 = arith.constant -5.000000e-01 : f32
    %50 = vector.broadcast %cst_29 : f32 to vector<3x128xf32>
    %51 = arith.mulf %50, %49 : vector<3x128xf32>
    %52 = arith.mulf %51, %49 : vector<3x128xf32>
    %53 = math.log %46 : vector<3x128xf32>
    %54 = arith.subf %52, %53 : vector<3x128xf32>
    %cst_30 = arith.constant 6.28318548 : f32
    %55 = math.log %cst_30 : f32
    %cst_31 = arith.constant 5.000000e-01 : f32
    %56 = arith.mulf %cst_31, %55 : f32
    %57 = vector.broadcast %56 : f32 to vector<3x128xf32>
    %58 = arith.subf %54, %57 : vector<3x128xf32>
    %cst_32 = arith.constant dense<0.000000e+00> : vector<128xf32>
    %59 = vector.multi_reduction <add>, %58, %cst_32 [0] : vector<3x128xf32> to vector<128xf32>
    %60 = vector.shape_cast %59 : vector<128xf32> to vector<1x128xf32>
    %cst_33 = arith.constant 0.000000e+00 : f32
    %61 = vector.broadcast %cst_33 : f32 to vector<1x128xf32>
    %62 = tpu.concatenate %36, %46, %60, %61 in 0 : vector<3x128xf32>, vector<3x128xf32>, vector<1x128xf32>, vector<1x128xf32> -> vector<8x128xf32>
    %c0_34 = arith.constant 0 : index
    %c0_35 = arith.constant 0 : index
    %63 = vector.load %arg12[%c0_34, %c0_35] : memref<8x128xf32, #tpu.memory_space<vmem>>, vector<8x128xf32>
    tpu.vector_store %arg12[%c0_34, %c0_35], %62 {strides = array<i32>} : memref<8x128xf32, #tpu.memory_space<vmem>>, vector<8x128xf32>,
    return
  }
  func.func @transform_0(%arg0: i32) -> (i32, i32) {
    %c0_i32 = arith.constant 0 : i32
    %c0_i32_0 = arith.constant 0 : i32
    %c0_i32_1 = arith.constant 0 : i32
    return %c0_i32, %c0_i32_0 : i32, i32
  }
  func.func @transform_1(%arg0: i32) -> (i32, i32) {
    %c0_i32 = arith.constant 0 : i32
    %c0_i32_0 = arith.constant 0 : i32
    return %c0_i32, %arg0 : i32, i32
  }
  func.func @transform_2(%arg0: i32) -> (i32, i32) {
    %c0_i32 = arith.constant 0 : i32
    %c0_i32_0 = arith.constant 0 : i32
    return %c0_i32, %arg0 : i32, i32
  }
  func.func @transform_3(%arg0: i32) -> (i32, i32) {
    %c0_i32 = arith.constant 0 : i32
    %c0_i32_0 = arith.constant 0 : i32
    %c0_i32_1 = arith.constant 0 : i32
    return %c0_i32, %c0_i32_0 : i32, i32
  }
  func.func @transform_4(%arg0: i32) -> (i32, i32) {
    %c0_i32 = arith.constant 0 : i32
    %c0_i32_0 = arith.constant 0 : i32
    %c0_i32_1 = arith.constant 0 : i32
    return %c0_i32, %c0_i32_0 : i32, i32
  }
  func.func @transform_5(%arg0: i32) -> (i32, i32) {
    %c0_i32 = arith.constant 0 : i32
    %c0_i32_0 = arith.constant 0 : i32
    %c0_i32_1 = arith.constant 0 : i32
    return %c0_i32, %c0_i32_0 : i32, i32
  }
  func.func @transform_6(%arg0: i32) -> (i32, i32) {
    %c0_i32 = arith.constant 0 : i32
    %c0_i32_0 = arith.constant 0 : i32
    %c0_i32_1 = arith.constant 0 : i32
    return %c0_i32, %c0_i32_0 : i32, i32
  }
  func.func @transform_7(%arg0: i32) -> (i32, i32) {
    %c0_i32 = arith.constant 0 : i32
    %c0_i32_0 = arith.constant 0 : i32
    %c0_i32_1 = arith.constant 0 : i32
    return %c0_i32, %c0_i32_0 : i32, i32
  }
  func.func @transform_8(%arg0: i32) -> (i32, i32) {
    %c0_i32 = arith.constant 0 : i32
    %c0_i32_0 = arith.constant 0 : i32
    %c0_i32_1 = arith.constant 0 : i32
    return %c0_i32, %c0_i32_0 : i32, i32
  }
  func.func @transform_9(%arg0: i32) -> (i32, i32) {
    %c0_i32 = arith.constant 0 : i32
    %c0_i32_0 = arith.constant 0 : i32
    %c0_i32_1 = arith.constant 0 : i32
    return %c0_i32, %c0_i32_0 : i32, i32
  }
  func.func @transform_10(%arg0: i32) -> (i32, i32) {
    %c0_i32 = arith.constant 0 : i32
    %c0_i32_0 = arith.constant 0 : i32
    %c0_i32_1 = arith.constant 0 : i32
    return %c0_i32, %c0_i32_0 : i32, i32
  }
  func.func @transform_11(%arg0: i32) -> (i32, i32) {
    %c0_i32 = arith.constant 0 : i32
    %c0_i32_0 = arith.constant 0 : i32
    return %c0_i32, %arg0 : i32, i32
  }
}

</mosaic_0001>

<bundles_post_ra>
// kernel: tpu_custom_call.1
= control target key start
LH: loop header
LB: loop body
LE: loop exit
PB: predicated region body
PF: predicated region fallthrough
CT: control target
= control target key end

     0   :  { %vm90_vm0 = vcmask 1040384   ;;  %vm91_vm1 = vcmask 1041408   ;;  %v730_v3 = vmov 65535   ;;  %vm83_vm2 = vcmask 23552   ;;  %s923_s0 = inlined_call_operand.<no memory space> [shape: f32[1,1], index: 0, kind: input, shape index: {}]   ;;  %s924_s1 = inlined_call_operand.vmem [shape: f32[3,128], index: 1, kind: input, shape index: {}]   ;;  %s925_s2 = inlined_call_operand.vmem [shape: f32[3,128], index: 2, kind: input, shape index: {}]   ;;  %s926_s3 = inlined_call_operand.vmem [shape: bf16[32,3], index: 3, kind: input, shape index: {}]   ;;  %s927_s4 = inlined_call_operand.vmem [shape: f32[32,1], index: 4, kind: input, shape index: {}]   ;;  %s928_s5 = inlined_call_operand.vmem [shape: bf16[64,32], index: 5, kind: input, shape index: {}]   ;;  %s929_s6 = inlined_call_operand.vmem [shape: f32[64,1], index: 6, kind: input, shape index: {}]   ;;  %s930_s7 = inlined_call_operand.vmem [shape: bf16[64,64], index: 7, kind: input, shape index: {}]   ;;  %s931_s8 = inlined_call_operand.vmem [shape: f32[64,1], index: 8, kind: input, shape index: {}]   ;;  %s932_s9 = inlined_call_operand.vmem [shape: bf16[8,64], index: 9, kind: input, shape index: {}]   ;;  %s933_s10 = inlined_call_operand.vmem [shape: f32[8,1], index: 10, kind: input, shape index: {}]   ;;  %s934_s11 = inlined_call_operand.hbm [shape: f32[8,128], index: 11, kind: output, shape index: {}]  }
   0x1   :  { %v42_v0 = vld [vmem:[%s924_s1] sm:$0x7]  ;;  %v92_v4 = vsel %vm90_vm0, 4294967295, %v730_v3  ;;  %v51_v8 = vld [vmem:[%s927_s4 + $0x10] sm:$0xff]  ;;  %v731_v9 = vmov 0   ;;  %v687_v10 = vld [vmem:[%s926_s3 + $0x8] sm:$0xff]  }
   0x2   :  { %v686_v1 = vld [vmem:[%s926_s3] sm:$0xff]   ;;  %v48_v2 = vpack.c.bf16 %v42_v0, %v42_v0  ;;  %v93_v5 = vsel %vm91_vm1, %v92_v4, 0  ;;  %684 = vset.pattern.permute.xlu0 %v731_v9  ;;  %685 = vset.pattern.permute.xlu1 %v731_v9  ;;  %v50_v11 = vld [vmem:[%s927_s4 + $0x8] sm:$0xff]  ;;  %v52_v12 = vld [vmem:[%s927_s4 + $0x18] sm:$0xff] }
   0x3   :  { %635 = vmatprep.mubr.msk.bf16.mxu0 %vm83_vm2, %v686_v1  ;;  %v49_v7 = vld [vmem:[%s927_s4] sm:$0xff]  ;;  %65 = vperm.xlu1 %685, %v51_v8   ;;  %v161_v14 = vld [vmem:[%s929_s6 + $0x8] sm:$0xff]  ;;  %v162_v15 = vld [vmem:[%s929_s6 + $0x10] sm:$0xff] }
   0x4   :  { %v95_v6 = vand.u32 %v93_v5, %v48_v2  ;;  %55 = vperm.xlu0 %684, %v49_v7   ;;  %v160_v13 = vld [vmem:[%s929_s6] sm:$0xff]  ;;  %v163_v16 = vld [vmem:[%s929_s6 + $0x18] sm:$0xff] }
   0x6   :  { %633 = vmatprep.subr.bf16.mxu0 %v95_v6 }
   0x7   :  { %634 = vmatpush3.bf16.msra.mxu0 %v95_v6  ;;  %70 = vperm.xlu1 %685, %v52_v12  }
   0x8   :  { %60 = vperm.xlu0 %684, %v50_v11  }
   0xa   :  { %636 = vmatmul.mubr.msk.bf16.vlgmr.msra.gmra.mrb[0].mxu0 %vm83_vm2, %v687_v10 }
   0xb   :  { %175 = vperm.xlu1 %685, %v161_v14  }
   0xc   :  { %170 = vperm.xlu0 %684, %v160_v13  }
   0xd   :  { %17 = vsyncpa [#allocation4], 0  ;;  %v164_v17 = vld [vmem:[%s929_s6 + $0x20] sm:$0xff]  ;;  %v165_v18 = vld [vmem:[%s929_s6 + $0x28] sm:$0xff]  ;;  %vm228_vm3 = vcmask 261120   ;;  %vm394_vm4 = vcmask 523264  }
   0xe   :  { %v166_v19 = vld [vmem:[%s929_s6 + $0x30] sm:$0xff]  ;;  %v167_v20 = vld [vmem:[%s929_s6 + $0x38] sm:$0xff]  ;;  %v326_v21 = vld [vmem:[%s931_s8] sm:$0xff]  ;;  %vm733_vm5 = vmmov 0   ;;  %vm560_vm6 = vcmask 1042432   ;;  %vm569_vm7 = vcmask 1045504  }
   0xf   :  { %185 = vperm.xlu1 %685, %v163_v16   ;;  %v327_v22 = vld [vmem:[%s931_s8 + $0x8] sm:$0xff]  ;;  %v328_v23 = vld [vmem:[%s931_s8 + $0x10] sm:$0xff]  ;;  %v329_v24 = vld [vmem:[%s931_s8 + $0x18] sm:$0xff]  ;;  %vm571_vm8 = vcmask 1046528  }
  0x10   :  { %180 = vperm.xlu0 %684, %v162_v15   ;;  %v330_v25 = vld [vmem:[%s931_s8 + $0x20] sm:$0xff]  ;;  %v331_v26 = vld [vmem:[%s931_s8 + $0x28] sm:$0xff]  ;;  %v332_v27 = vld [vmem:[%s931_s8 + $0x30] sm:$0xff] }
  0x11   :  { %v333_v28 = vld [vmem:[%s931_s8 + $0x38] sm:$0xff]  ;;  %v485_v29 = vld [vmem:[%s933_s10] sm:$0xff]  ;;  %v689_v49 = vld [vmem:[%s928_s5 + $0x8] sm:$0xff]  }
  0x12   :  { %v688_v30 = vld [vmem:[%s928_s5] sm:$0xff]   ;;  %v690_v50 = vld [vmem:[%s928_s5 + $0x10] sm:$0xff]   ;;  %v691_v51 = vld [vmem:[%s928_s5 + $0x18] sm:$0xff]  }
  0x13   :  { %195 = vperm.xlu1 %685, %v165_v18   ;;  %643 = vmatprep.mubr.msk.bf16.mxu1 %vm228_vm3, %v688_v30  ;;  %v692_v52 = vld [vmem:[%s930_s7] sm:$0xff]  }
  0x14   :  { %190 = vperm.xlu0 %684, %v164_v17   ;;  %659 = vmatprep.mubr.msk.bf16.mxu0 %vm394_vm4, %v692_v52 }
  0x17   :  { %205 = vperm.xlu1 %685, %v167_v20  }
  0x18   :  { %200 = vperm.xlu0 %684, %v166_v19  }
  0x1b   :  { %341 = vperm.xlu1 %685, %v327_v22  }
  0x1c   :  { %336 = vperm.xlu0 %684, %v326_v21  }
  0x1f   :  { %351 = vperm.xlu1 %685, %v329_v24  }
  0x20   :  { %346 = vperm.xlu0 %684, %v328_v23  }
  0x23   :  { %361 = vperm.xlu1 %685, %v331_v26   ;;  %v694_v26 = vld [vmem:[%s930_s7 + $0x10] sm:$0xff]  }
  0x24   :  { %356 = vperm.xlu0 %684, %v330_v25   ;;  %v693_v25 = vld [vmem:[%s930_s7 + $0x8] sm:$0xff]  }
  0x27   :  { %371 = vperm.xlu1 %685, %v333_v28   ;;  %v732_v28 = vmov 0.0  }
  0x28   :  { %366 = vperm.xlu0 %684, %v332_v27   ;;  %v695_v27 = vld [vmem:[%s930_s7 + $0x18] sm:$0xff]  }
  0x2c   :  { %488 = vperm.xlu0 %684, %v485_v29  }
  0x82   :  { %v66_v31 = vpop.permute.xlu1 %65 }
  0x83   :  { %v56_v32 = vpop.permute.xlu0 %55 }
  0x86   :  { %v71_v36 = vpop.permute.xlu1 %70 }
  0x87   :  { %v61_v39 = vpop.permute.xlu0 %60 }
  0x8a   :  { %v176_v54 = vpop.permute.xlu1 %175 }
  0x8b   :  { %v171_v53 = vpop.permute.xlu0 %170 }
  0x8e   :  { %v186_v56 = vpop.permute.xlu1 %185 }
  0x8f   :  { %v181_v55 = vpop.permute.xlu0 %180 }
  0x92   :  { %v196_v1 = vpop.permute.xlu1 %195 }
  0x93   :  { %v191_v60 = vpop.permute.xlu0 %190 }
  0x96   :  { %v206_v13 = vpop.permute.xlu1 %205 }
  0x97   :  { %v201_v8 = vpop.permute.xlu0 %200 }
  0x9a   :  { %v342_v30 = vpop.permute.xlu1 %341 }
  0x9b   :  { %v337_v29 = vpop.permute.xlu0 %336 }
  0xdd   :  { %v637_v33 = vpop.f32.mrb[0].mxu0 }
  0xde   :  { %v140_v34 = vadd.f32 %v637_v33, %v66_v31  ;;  %v131_v35 = vpop.f32.mrb[1].mxu0  ;;  %v347_v31 = vpop.permute.xlu0 %346 }
  0xdf   :  { %v132_v37 = vadd.f32 %v131_v35, %v56_v32  ;;  %v638_v38 = vpop.f32.mrb[2].mxu0  ;;  %v352_v32 = vpop.permute.xlu1 %351 }
  0xe0   :  { %v143_v40 = vadd.f32 %v638_v38, %v71_v36  ;;  %v134_v41 = vpop.f32.mrb[3].mxu0  ;;  %v148_v43 = vmax.f32 %v140_v34, 0.0 }
  0xe1   :  { %v135_v42 = vadd.f32 %v134_v41, %v61_v39  ;;  %v146_v45 = vmax.f32 %v132_v37, 0.0 }
  0xe2   :  { %v149_v44 = vmax.f32 %v143_v40, 0.0  ;;  %v357_v36 = vpop.permute.xlu0 %356 }
  0xe3   :  { %v147_v46 = vmax.f32 %v135_v42, 0.0  ;;  %v362_v41 = vpop.permute.xlu1 %361 }
  0xe4   :  { %v159_v47 = vpack.c.bf16 %v149_v44, %v148_v43 }
  0xe5   :  { %v158_v48 = vpack.c.bf16 %v147_v46, %v146_v45 }
  0xe7   :  { %639 = vmatprep.subr.bf16.mxu1 %v158_v48 }
  0xe8   :  { %640 = vmatpush3.bf16.msra.mxu1 %v158_v48  ;;  %v367_v48 = vpop.permute.xlu0 %366 }
  0xe9   :  { %641 = vmatprep.subr.bf16.mxu1 %v159_v47 }
  0xec   :  { %642 = vmatpush3.bf16.msra.mxu1 %v159_v47 }
  0xed   :  { %667 = vmatprep.subr.bf16.mxu1 %v732_v28 }
  0xef   :  { %644 = vmatmul.mubr.msk.bf16.vlgmr.msra.gmra.mrb[0].mxu1 %vm228_vm3, %v689_v49 }
  0xf0   :  { %647 = vmatprep.mubr.msk.bf16.mxu1 %vm228_vm3, %v690_v50 }
  0xf7   :  { %648 = vmatmul.mubr.msk.bf16.gmra.mrb[4].mxu1 %vm228_vm3, %v691_v51 }
  0xf8   :  { %675 = vmatprep.mubr.msk.bf16.mxu1 %vm733_vm5, %v732_v28 }
 0x1c2   :  { %v645_v57 = vpop.f32.mrb[0].mxu1 }
 0x1c3   :  { %v284_v58 = vadd.f32 %v645_v57, %v181_v55  ;;  %v275_v59 = vpop.f32.mrb[1].mxu1 }
 0x1c4   :  { %v276_v61 = vadd.f32 %v275_v59, %v171_v53  ;;  %v646_v62 = vpop.f32.mrb[2].mxu1  ;;  %v372_v53 = vpop.permute.xlu1 %371 }
 0x1c5   :  { %v287_v63 = vadd.f32 %v646_v62, %v186_v56  ;;  %v278_v0 = vpop.f32.mrb[3].mxu1  ;;  %v308_v3 = vmax.f32 %v284_v58, 0.0 }
 0x1c6   :  { %v279_v2 = vadd.f32 %v278_v0, %v176_v54  ;;  %v306_v5 = vmax.f32 %v276_v61, 0.0 }
 0x1c7   :  { %v309_v4 = vmax.f32 %v287_v63, 0.0 }
 0x1c8   :  { %v307_v6 = vmax.f32 %v279_v2, 0.0  ;;  %v489_v2 = vpop.permute.xlu0 %488 }
 0x1c9   :  { %v323_v7 = vpack.c.bf16 %v309_v4, %v308_v3 }
 0x1ca   :  { %v322_v9 = vpack.c.bf16 %v307_v6, %v306_v5  ;;  %v649_v10 = vpop.f32.mrb[4].mxu1 }
 0x1cb   :  { %v300_v11 = vadd.f32 %v649_v10, %v201_v8  ;;  %v291_v12 = vpop.f32.mrb[5].mxu1 }
 0x1cc   :  { %v292_v14 = vadd.f32 %v291_v12, %v191_v60  ;;  %v650_v15 = vpop.f32.mrb[6].mxu1  ;;  %651 = vmatprep.subr.bf16.mxu0 %v322_v9 }
 0x1cd   :  { %v303_v16 = vadd.f32 %v650_v15, %v206_v13  ;;  %v294_v17 = vpop.f32.mrb[7].mxu1  ;;  %652 = vmatpush3.bf16.msra.mxu0 %v322_v9  ;;  %v312_v19 = vmax.f32 %v300_v11, 0.0  ;;  %v535_v13 = vstv %s923_s0  ;;  %s734_s0 = smov [#allocation3]  }
 0x1ce   :  { %v295_v18 = vadd.f32 %v294_v17, %v196_v1  ;;  %653 = vmatprep.subr.bf16.mxu0 %v323_v7  ;;  %v310_v21 = vmax.f32 %v292_v14, 0.0  ;;  %v480_v1 = vld [vmem:[%s932_s9] sm:$0xf] }
 0x1cf   :  { %v313_v20 = vmax.f32 %v303_v16, 0.0  ;;  %v43_v17 = vld [vmem:[%s925_s2] sm:$0x7]  ;;  %s580_s2 = sshll.u32 %s734_s0, 4  ;;  %s581_s2 = int_to_ptr.vmem [resolvable:$true] %s580_s2 }
 0x1d0   :  { %v311_v22 = vmax.f32 %v295_v18, 0.0  ;;  %s706_s15 = scalar_lea.vmem %s581_s2, 128  ;;  %p711_p1 = scmp.lt.s32.totalorder %s581_s2, %s581_s2 }
 0x1d1   :  { %v325_v23 = vpack.c.bf16 %v313_v20, %v312_v19  ;;  %654 = vmatpush3.bf16.msra.mxu0 %v323_v7  ;;  %p707_p0 = scmp.ne.s32.totalorder %s581_s2, %s706_s15  ;;  %p712_p2 = scmp.lt.s32.totalorder %s706_s15, %s706_s15 }
 0x1d2   :  { %v324_v24 = vpack.c.bf16 %v311_v22, %v310_v21 }
 0x1d3   :  { %p713_p3 = por %p712_p2, %p711_p1 }
 0x1d4   :  { %655 = vmatprep.subr.bf16.mxu0 %v324_v24 }
 0x1d5   :  { %656 = vmatpush3.bf16.msra.mxu0 %v324_v24  ;;  %p714_p4 = pnand %p713_p3, %p707_p0 }
 0x1d6   :  { %657 = vmatprep.subr.bf16.mxu0 %v325_v23 }
 0x1d9   :  { %658 = vmatpush3.bf16.msra.mxu0 %v325_v23 }
 0x1dc   :  { %660 = vmatmul.mubr.msk.bf16.vlgmr.msra.gmra.mrb[4].mxu0 %vm394_vm4, %v693_v25 }
 0x1dd   :  { %663 = vmatprep.mubr.msk.bf16.mxu0 %vm394_vm4, %v694_v26 }
 0x1e4   :  { %664 = vmatmul.mubr.msk.bf16.gmra.mrb[8].mxu0 %vm394_vm4, %v695_v27 }
 0x2af   :  { %v661_v33 = vpop.f32.mrb[4].mxu0 }
 0x2b0   :  { %v450_v34 = vadd.f32 %v661_v33, %v347_v31  ;;  %v441_v35 = vpop.f32.mrb[5].mxu0 }
 0x2b1   :  { %v442_v37 = vadd.f32 %v441_v35, %v337_v29  ;;  %v662_v38 = vpop.f32.mrb[6].mxu0 }
 0x2b2   :  { %v453_v39 = vadd.f32 %v662_v38, %v352_v32  ;;  %v444_v40 = vpop.f32.mrb[7].mxu0  ;;  %v474_v43 = vmax.f32 %v450_v34, 0.0 }
 0x2b3   :  { %v445_v42 = vadd.f32 %v444_v40, %v342_v30  ;;  %v472_v45 = vmax.f32 %v442_v37, 0.0 }
 0x2b4   :  { %v475_v44 = vmax.f32 %v453_v39, 0.0 }
 0x2b5   :  { %v473_v46 = vmax.f32 %v445_v42, 0.0 }
 0x2b6   :  { %v482_v47 = vpack.c.bf16 %v475_v44, %v474_v43 }
 0x2b7   :  { %v481_v49 = vpack.c.bf16 %v473_v46, %v472_v45  ;;  %v665_v50 = vpop.f32.mrb[8].mxu0 }
 0x2b8   :  { %v466_v51 = vadd.f32 %v665_v50, %v367_v48  ;;  %v457_v52 = vpop.f32.mrb[9].mxu0 }
 0x2b9   :  { %v458_v54 = vadd.f32 %v457_v52, %v357_v36  ;;  %v666_v55 = vpop.f32.mrb[10].mxu0  ;;  %668 = vmatpush3.bf16.msra.mxu1 %v481_v49 }
 0x2ba   :  { %v469_v56 = vadd.f32 %v666_v55, %v372_v53  ;;  %v460_v57 = vpop.f32.mrb[11].mxu0  ;;  %669 = vmatprep.subr.bf16.mxu1 %v732_v28  ;;  %v478_v59 = vmax.f32 %v466_v51, 0.0 }
 0x2bb   :  { %v461_v58 = vadd.f32 %v460_v57, %v362_v41  ;;  %v476_v61 = vmax.f32 %v458_v54, 0.0 }
 0x2bc   :  { %v479_v60 = vmax.f32 %v469_v56, 0.0 }
 0x2bd   :  { %v477_v62 = vmax.f32 %v461_v58, 0.0  ;;  %670 = vmatpush3.bf16.msra.mxu1 %v482_v47 }
 0x2be   :  { %v484_v63 = vpack.c.bf16 %v479_v60, %v478_v59  ;;  %671 = vmatprep.subr.bf16.mxu1 %v732_v28 }
 0x2bf   :  { %v483_v0 = vpack.c.bf16 %v477_v62, %v476_v61 }
 0x2c1   :  { %672 = vmatpush3.bf16.msra.mxu1 %v483_v0 }
 0x2c2   :  { %673 = vmatprep.subr.bf16.mxu1 %v732_v28 }
 0x2c5   :  { %674 = vmatpush3.bf16.msra.mxu1 %v484_v63 }
 0x2c8   :  { %676 = vmatmul.mubr.msk.bf16.vlgmr.msra.gmra.mrb[8].mxu1 %vm394_vm4, %v480_v1 }
 0x39b   :  { %v528_v3 = vpop.f32.mrb[8].mxu1 }
 0x39c   :  { %v529_v4 = vadd.f32 %v528_v3, %v489_v2  ;;  %v677_v5 = vpop.f32.mrb[9].mxu1 }
 0x39d   :  { %v531_v6 = vpop.f32.mrb[10].mxu1 }
 0x39e   :  { %v609_v7 = vmul.f32 -1.442695, %v529_v4  ;;  %v678_v8 = vpop.f32.mrb[11].mxu1 }
 0x3a0   :  { %696 = vpow2.f32 %v609_v7 }
 0x3aa   :  { %v697_v9 = vpop.eup %696 }
 0x3ab   :  { %v540_v10 = vadd.f32 1.0, %v697_v9 }
 0x3ad   :  { %698 = vrcp.f32 %v540_v10 }
 0x3ae   :  { %700 = vtanh.f32 %v529_v4 }
 0x3b7   :  { %v699_v11 = vpop.eup %698 }
 0x3b8   :  { %v543_v12 = vadd.f32 1e-08, %v699_v11  ;;  %v701_v15 = vpop.eup %700 }
 0x3b9   :  { %v536_v16 = vmul.f32 %v701_v15, %v535_v13 }
 0x3ba   :  { %v544_v14 = vmul.f32 %v543_v12, %v535_v13 }
 0x3bb   :  { %v546_v20 = vsub.f32 %v43_v17, %v536_v16 }
 0x3bc   :  { %702 = vrcp.f32 %v544_v14  ;;  %v568_v36 = vsel %vm560_vm6, %v536_v16, %v544_v14 }
 0x3bd   :  { %704 = vlog2.f32 %v544_v14 }
 0x3c6   :  { %v703_v18 = vpop.eup %702 }
 0x3c7   :  { %v705_v19 = vpop.eup %704  ;;  %v548_v21 = vrot.slane %v703_v18, 3 }
 0x3c8   :  { %v554_v23 = vmul.f32 0.6931472, %v705_v19 }
 0x3c9   :  { %v550_v22 = vmul.f32 %v548_v21, %v546_v20 }
 0x3ca   :  { %v556_v26 = vrot.slane %v554_v23, 3 }
 0x3cb   :  { %v551_v24 = vmul.f32 -0.5, %v550_v22 }
 0x3cd   :  { %v552_v25 = vmul.f32 %v551_v24, %v550_v22 }
 0x3cf   :  { %v558_v27 = vsub.f32 %v552_v25, %v556_v26 }
 0x3d1   :  { %v610_v28 = vadd.f32 -0.9189385, %v558_v27 }
 0x3d3   :  { %v561_v29 = vsel %vm560_vm6, %v610_v28, 0.0 }
 0x3d4   :  { %v562_v30 = vrot.slane %v561_v29, 4 }
 0x3d6   :  { %v563_v31 = vadd.f32 %v562_v30, %v561_v29 }
 0x3d8   :  { %v564_v32 = vrot.slane %v563_v31, 2 }
 0x3da   :  { %v565_v33 = vadd.f32 %v564_v32, %v563_v31 }
 0x3dc   :  { %v566_v34 = vrot.slane %v565_v33, 1 }
 0x3de   :  { %v567_v35 = vadd.f32 %v566_v34, %v565_v33 }
 0x3e0   :  { %v570_v37 = vsel %vm569_vm7, %v568_v36, %v567_v35 }
 0x3e1   :  { %v572_v38 = vsel %vm571_vm8, %v570_v37, 0.0 }
 0x3e2   :  { %573 = vst [vmem:[#allocation3] sm:$0xff] %v572_v38 }
 0x3e3   :  { %717 = shalt.err (!%p714_p4)
}
 0x3e4   :  { %s718_s17 = scalar_lea.hbm %s934_s11, 128 }
 0x3e5   :  { %p719_p5 = scmp.ne.s32.totalorder %s934_s11, %s718_s17  ;;  %p722_p6 = scmp.lt.u32.totalorder %s718_s17, %s934_s11 }
 0x3e7   :  { %p724_p7 = pnand %p722_p6, %p719_p5 }
 0x3e9   :  { %727 = shalt.err (!%p724_p7)
}
 0x3ea   :  { %583 = dma.vmem_to_hbm [thread:$0]  %s581_s2, 128, %s934_s11, [#allocation4]  }
 0x3eb   :  { %728 = dma.done.wait [#allocation4], 128  }
 0x3ec   :  { %729 = vsyncadd [#allocation4], 4294967168 }
 0x3ed   :  { %587 = vsyncpa [#allocation4], 1 }

</bundles_post_ra>
